<compile_context>
chip_gen: v5e
topology: v5e:2x2
jax: 0.10.0
libtpu: 0.0.40
codegen_flags: <defaults>
</compile_context>

<pallas_src>
import functools

import jax
import jax.numpy as jnp
from jax.experimental import pallas as pl
from jax.experimental.pallas import tpu as pltpu  # noqa: F401  (TPU backend)


# ----------------------------------------------------------------------------
# Fused self-attention kernel (whole batch in one grid step)
# ----------------------------------------------------------------------------

def _self_attention_kernel(q_ref, k_ref, v_ref, wq_ref, wk_ref, wv_ref, wo_ref,
                           o_ref, *, N, Lq, Lk, heads, head_dim, scale):
    """Fully fused multi-head self-attention.

    Ref shapes:
      q_ref         : (N*Lq, E)        flat activations, E on the lane axis
      k_ref / v_ref : (N*Lk, E)
      wq/wk/wv_ref  : (E, E)           block-diagonal kron(I_heads, W.T)
      wo_ref        : (E, E)           wo.T
      o_ref         : (N*Lq, E)
    """
    E = heads * head_dim

    # Merged q/k/v projections: ONE lane-dense (rows, E) @ (E, E) MXU
    # contraction each (block-diagonal weight == shared per-head Linear).
    qp = jnp.dot(q_ref[...], wq_ref[...], preferred_element_type=jnp.float32)
    kp = jnp.dot(k_ref[...], wk_ref[...], preferred_element_type=jnp.float32)
    vp = jnp.dot(v_ref[...], wv_ref[...], preferred_element_type=jnp.float32)

    # Softmax scale applied AFTER the projection (== scaling the scores), so
    # the math stays exact even if the per-head Linear ever grows a bias.
    qp = qp * scale

    # Leading-dim split only (lane dim E unchanged) -> cheap relayout.
    qp = qp.reshape(N, Lq, E)
    kp = kp.reshape(N, Lk, E)
    vp = vp.reshape(N, Lk, E)

    # Per-head scaled dot-product attention.  Heads live on static lane slices;
    # each einsum is an N-batched MXU contraction (no in-kernel transpose).
    head_outs = []
    for h in range(heads):
        sl = slice(h * head_dim, (h + 1) * head_dim)
        q_h = qp[:, :, sl]                                        # (N, Lq, hd)
        k_h = kp[:, :, sl]                                        # (N, Lk, hd)
        v_h = vp[:, :, sl]                                        # (N, Lk, hd)

        s = jnp.einsum('nqd,nkd->nqk', q_h, k_h,
                       preferred_element_type=jnp.float32)        # (N, Lq, Lk)
        # NOTE: the reference's masked_fill is NOT in-place -> the mask has no
        # effect on the output; it is intentionally not applied here either.
        s = s - jnp.max(s, axis=-1, keepdims=True)
        p = jnp.exp(s)
        p = p * pl.reciprocal(jnp.sum(p, axis=-1, keepdims=True), approx=True)
        head_outs.append(
            jnp.einsum('nqk,nkd->nqd', p, v_h,
                       preferred_element_type=jnp.float32))       # (N, Lq, hd)

    # Reassemble heads on the lane axis, then a SINGLE output projection with
    # contraction K = E (replaces per-head matmuls + cross-head reduce), and a
    # single (N*Lq, E) slab store.
    o = jnp.concatenate(head_outs, axis=-1)                       # (N, Lq, E)
    o = o.reshape(N * Lq, E)                                      # leading merge
    o_ref[...] = jnp.dot(o, wo_ref[...], preferred_element_type=jnp.float32)


# ----------------------------------------------------------------------------
# Wrapper: host-side layout plumbing + a single pallas_call
# ----------------------------------------------------------------------------

def self_attention_pallas(key, query, value, wq, wk, wv, wo, *, heads, mask=None):
    """SelfAttention.forward(key, query, value, mask).

    WARNING: `mask` is accepted but IGNORED -- the reference's masked_fill is
    not in-place, so the PyTorch module's output does not depend on the mask.
    # TODO(synk): if the reference module is ever fixed to mask in-place, add
    #             `s = jnp.where(mask == 0, -1e20, s)` before the softmax.
    """
    del mask
    N, Lq, E = query.shape
    Lk = key.shape[1]
    Lv = value.shape[1]
    assert E % heads == 0, "heads splitting is not consistent with embed size"
    assert Lk == Lv, "key and value sequence lengths must match"
    head_dim = E // heads
    scale = 1.0 / (float(E) ** 0.5)

    # Flat, lane-dense activation layout (free XLA-side reshape).
    q2 = query.reshape(N * Lq, E).astype(jnp.float32)
    k2 = key.reshape(N * Lk, E).astype(jnp.float32)
    v2 = value.reshape(N * Lv, E).astype(jnp.float32)

    # Shared per-head Linear expanded once on the host to a block-diagonal
    # (E, E) matrix: x @ kron(I_H, W.T) applies W.T independently to each head
    # slice.  Output projection is simply wo.T.
    eye_h = jnp.eye(heads, dtype=jnp.float32)
    wq_bd = jnp.kron(eye_h, wq.T.astype(jnp.float32))             # (E, E)
    wk_bd = jnp.kron(eye_h, wk.T.astype(jnp.float32))             # (E, E)
    wv_bd = jnp.kron(eye_h, wv.T.astype(jnp.float32))             # (E, E)
    wo_t = wo.T.astype(jnp.float32)                               # (E, E)

    kernel = functools.partial(_self_attention_kernel, N=N, Lq=Lq, Lk=Lk,
                               heads=heads, head_dim=head_dim, scale=scale)

    out2 = pl.pallas_call(
        kernel,
        out_shape=jax.ShapeDtypeStruct((N * Lq, E), jnp.float32),
        grid=(1,),                                     # whole batch, one step
        in_specs=[
            pl.BlockSpec((N * Lq, E), lambda i: (0, 0)),
            pl.BlockSpec((N * Lk, E), lambda i: (0, 0)),
            pl.BlockSpec((N * Lv, E), lambda i: (0, 0)),
            pl.BlockSpec((E, E), lambda i: (0, 0)),
            pl.BlockSpec((E, E), lambda i: (0, 0)),
            pl.BlockSpec((E, E), lambda i: (0, 0)),
            pl.BlockSpec((E, E), lambda i: (0, 0)),
        ],
        out_specs=pl.BlockSpec((N * Lq, E), lambda i: (0, 0)),
    )(q2, k2, v2, wq_bd, wk_bd, wv_bd, wo_t)

    return out2.reshape(N, Lq, E)


# ----------------------------------------------------------------------------
# Pure-JAX reference (mirrors the PyTorch module exactly, mask ignored)
# ----------------------------------------------------------------------------

def self_attention_reference(key, query, value, wq, wk, wv, wo, *, heads):
    N, Lq, E = query.shape
    hd = E // heads
    q = query.reshape(N, Lq, heads, hd) @ wq.T
    k = key.reshape(N, key.shape[1], heads, hd) @ wk.T
    v = value.reshape(N, value.shape[1], heads, hd) @ wv.T
    w = jnp.einsum('nqhd,nkhd->nhqk', q, k)
    a = jax.nn.softmax(w / (E ** 0.5), axis=3)
    out = jnp.einsum('nhqk,nkhd->nqhd', a, v).reshape(N, Lq, E)
    return out @ wo.T


# ----------------------------------------------------------------------------

if __name__ == "__main__":
    EMBED = 32
    HEADS = 4
    HEAD_DIM = EMBED // HEADS
    BATCH = 2
    SEQ = 8

    root = jax.random.PRNGKey(0)
    kk, kq, kv, kwq, kwk, kwv, kwo = jax.random.split(root, 7)

    def lin_w(rng, out_f, in_f):
        bound = 1.0 / (in_f ** 0.5)
        return jax.random.uniform(rng, (out_f, in_f), jnp.float32, -bound, bound)

    key_in = jax.random.normal(kk, (BATCH, SEQ, EMBED), jnp.float32)
    query_in = jax.random.normal(kq, (BATCH, SEQ, EMBED), jnp.float32)
    value_in = jax.random.normal(kv, (BATCH, SEQ, EMBED), jnp.float32)

    wq = lin_w(kwq, HEAD_DIM, HEAD_DIM)
    wk = lin_w(kwk, HEAD_DIM, HEAD_DIM)
    wv = lin_w(kwv, HEAD_DIM, HEAD_DIM)
    wo = lin_w(kwo, EMBED, EMBED)

    out = self_attention_pallas(key_in, query_in, value_in, wq, wk, wv, wo,
                                heads=HEADS, mask=None)
    out = jax.block_until_ready(out)

    assert out.shape == (BATCH, SEQ, EMBED), out.shape
    assert bool(jnp.all(jnp.isfinite(out)))

    ref = self_attention_reference(key_in, query_in, value_in, wq, wk, wv, wo,
                                   heads=HEADS)
    max_err = float(jnp.max(jnp.abs(out - ref)))
    assert max_err < 2e-2, f"mismatch vs reference: {max_err}"

    print("KERNEL_OK")
</pallas_src>

<mosaic_0001>
module attributes {stable_mosaic.version = 11 : i64} {
  func.func @_self_attention_kernel(%arg0: i32, %arg1: memref<16x32xf32, #tpu.memory_space<vmem>>, %arg2: memref<16x32xf32, #tpu.memory_space<vmem>>, %arg3: memref<16x32xf32, #tpu.memory_space<vmem>>, %arg4: memref<32x32xf32, #tpu.memory_space<vmem>>, %arg5: memref<32x32xf32, #tpu.memory_space<vmem>>, %arg6: memref<32x32xf32, #tpu.memory_space<vmem>>, %arg7: memref<32x32xf32, #tpu.memory_space<vmem>>, %arg8: memref<16x32xf32, #tpu.memory_space<vmem>>) attributes {dimension_semantics = [#tpu.dimension_semantics<arbitrary>], iteration_bounds = array<i64: 1>, scalar_prefetch = 0 : i64, scratch_operands = 0 : i64, tpu.core_type = #tpu.core_type<tc>, window_params = [{pipeline_mode = #tpu.pipeline_mode<synchronous>, transform_indices = @transform_0, window_bounds = array<i64: 16, 32>}, {pipeline_mode = #tpu.pipeline_mode<synchronous>, transform_indices = @transform_1, window_bounds = array<i64: 16, 32>}, {pipeline_mode = #tpu.pipeline_mode<synchronous>, transform_indices = @transform_2, window_bounds = array<i64: 16, 32>}, {pipeline_mode = #tpu.pipeline_mode<synchronous>, transform_indices = @transform_3, window_bounds = array<i64: 32, 32>}, {pipeline_mode = #tpu.pipeline_mode<synchronous>, transform_indices = @transform_4, window_bounds = array<i64: 32, 32>}, {pipeline_mode = #tpu.pipeline_mode<synchronous>, transform_indices = @transform_5, window_bounds = array<i64: 32, 32>}, {pipeline_mode = #tpu.pipeline_mode<synchronous>, transform_indices = @transform_6, window_bounds = array<i64: 32, 32>}, {pipeline_mode = #tpu.pipeline_mode<synchronous>, transform_indices = @transform_7, window_bounds = array<i64: 16, 32>}]} {
    %c0 = arith.constant 0 : index
    %c0_0 = arith.constant 0 : index
    %0 = vector.load %arg1[%c0, %c0_0] : memref<16x32xf32, #tpu.memory_space<vmem>>, vector<16x32xf32>
    %c0_1 = arith.constant 0 : index
    %c0_2 = arith.constant 0 : index
    %1 = vector.load %arg4[%c0_1, %c0_2] : memref<32x32xf32, #tpu.memory_space<vmem>>, vector<32x32xf32>
    %cst = arith.constant dense<0.000000e+00> : vector<16x32xf32>
    %2 = tpu.matmul %0, %1, %cst {dimension_numbers = #tpu.dot_dimension_numbers<[1], [0], [0], [1], [0, 0, 1, 1], [], []>} : vector<16x32xf32>, vector<32x32xf32>, vector<16x32xf32> -> vector<16x32xf32>
    %c0_3 = arith.constant 0 : index
    %c0_4 = arith.constant 0 : index
    %3 = vector.load %arg2[%c0_3, %c0_4] : memref<16x32xf32, #tpu.memory_space<vmem>>, vector<16x32xf32>
    %c0_5 = arith.constant 0 : index
    %c0_6 = arith.constant 0 : index
    %4 = vector.load %arg5[%c0_5, %c0_6] : memref<32x32xf32, #tpu.memory_space<vmem>>, vector<32x32xf32>
    %cst_7 = arith.constant dense<0.000000e+00> : vector<16x32xf32>
    %5 = tpu.matmul %3, %4, %cst_7 {dimension_numbers = #tpu.dot_dimension_numbers<[1], [0], [0], [1], [0, 0, 1, 1], [], []>} : vector<16x32xf32>, vector<32x32xf32>, vector<16x32xf32> -> vector<16x32xf32>
    %c0_8 = arith.constant 0 : index
    %c0_9 = arith.constant 0 : index
    %6 = vector.load %arg3[%c0_8, %c0_9] : memref<16x32xf32, #tpu.memory_space<vmem>>, vector<16x32xf32>
    %c0_10 = arith.constant 0 : index
    %c0_11 = arith.constant 0 : index
    %7 = vector.load %arg6[%c0_10, %c0_11] : memref<32x32xf32, #tpu.memory_space<vmem>>, vector<32x32xf32>
    %cst_12 = arith.constant dense<0.000000e+00> : vector<16x32xf32>
    %8 = tpu.matmul %6, %7, %cst_12 {dimension_numbers = #tpu.dot_dimension_numbers<[1], [0], [0], [1], [0, 0, 1, 1], [], []>} : vector<16x32xf32>, vector<32x32xf32>, vector<16x32xf32> -> vector<16x32xf32>
    %cst_13 = arith.constant 0.176776692 : f32
    %9 = vector.broadcast %cst_13 : f32 to vector<16x32xf32>
    %10 = arith.mulf %2, %9 : vector<16x32xf32>
    %11 = vector.shape_cast %10 : vector<16x32xf32> to vector<2x8x32xf32>
    %12 = vector.shape_cast %5 : vector<16x32xf32> to vector<2x8x32xf32>
    %13 = vector.shape_cast %8 : vector<16x32xf32> to vector<2x8x32xf32>
    %14 = vector.extract_strided_slice %11 {offsets = [0, 0, 0], sizes = [2, 8, 8], strides = [1, 1, 1]} : vector<2x8x32xf32> to vector<2x8x8xf32>
    %15 = vector.extract_strided_slice %12 {offsets = [0, 0, 0], sizes = [2, 8, 8], strides = [1, 1, 1]} : vector<2x8x32xf32> to vector<2x8x8xf32>
    %16 = vector.extract_strided_slice %13 {offsets = [0, 0, 0], sizes = [2, 8, 8], strides = [1, 1, 1]} : vector<2x8x32xf32> to vector<2x8x8xf32>
    "tpu.trace_start"() <{level = 10 : i32, message = "nqd,nkd->nqk"}> : () -> ()
    %cst_14 = arith.constant dense<0.000000e+00> : vector<2x8x8xf32>
    %17 = tpu.matmul %14, %15, %cst_14 {dimension_numbers = #tpu.dot_dimension_numbers<[2], [2], [1], [1], [0, 0, 0, 1, 1, 1], [0], [0]>} : vector<2x8x8xf32>, vector<2x8x8xf32>, vector<2x8x8xf32> -> vector<2x8x8xf32>
    "tpu.trace_stop"() : () -> ()
    %cst_15 = arith.constant dense<0xFF800000> : vector<2x8xf32>
    %18 = vector.multi_reduction <maximumf>, %17, %cst_15 [2] : vector<2x8x8xf32> to vector<2x8xf32>
    %19 = vector.shape_cast %18 : vector<2x8xf32> to vector<2x8x1xf32>
    %20 = vector.broadcast %19 : vector<2x8x1xf32> to vector<2x8x8xf32>
    %21 = arith.subf %17, %20 : vector<2x8x8xf32>
    %22 = math.exp %21 : vector<2x8x8xf32>
    %cst_16 = arith.constant dense<0.000000e+00> : vector<2x8xf32>
    %23 = vector.multi_reduction <add>, %22, %cst_16 [2] : vector<2x8x8xf32> to vector<2x8xf32>
    %24 = vector.shape_cast %23 : vector<2x8xf32> to vector<2x8x1xf32>
    %25 = tpu.reciprocal %24 {approx = true} : vector<2x8x1xf32> -> vector<2x8x1xf32>
    %26 = vector.broadcast %25 : vector<2x8x1xf32> to vector<2x8x8xf32>
    %27 = arith.mulf %22, %26 : vector<2x8x8xf32>
    "tpu.trace_start"() <{level = 10 : i32, message = "nqk,nkd->nqd"}> : () -> ()
    %cst_17 = arith.constant dense<0.000000e+00> : vector<2x8x8xf32>
    %28 = tpu.matmul %27, %16, %cst_17 {dimension_numbers = #tpu.dot_dimension_numbers<[2], [1], [1], [2], [0, 0, 0, 1, 1, 2], [0], [0]>} : vector<2x8x8xf32>, vector<2x8x8xf32>, vector<2x8x8xf32> -> vector<2x8x8xf32>
    "tpu.trace_stop"() : () -> ()
    %29 = vector.extract_strided_slice %11 {offsets = [0, 0, 8], sizes = [2, 8, 8], strides = [1, 1, 1]} : vector<2x8x32xf32> to vector<2x8x8xf32>
    %30 = vector.extract_strided_slice %12 {offsets = [0, 0, 8], sizes = [2, 8, 8], strides = [1, 1, 1]} : vector<2x8x32xf32> to vector<2x8x8xf32>
    %31 = vector.extract_strided_slice %13 {offsets = [0, 0, 8], sizes = [2, 8, 8], strides = [1, 1, 1]} : vector<2x8x32xf32> to vector<2x8x8xf32>
    "tpu.trace_start"() <{level = 10 : i32, message = "nqd,nkd->nqk"}> : () -> ()
    %cst_18 = arith.constant dense<0.000000e+00> : vector<2x8x8xf32>
    %32 = tpu.matmul %29, %30, %cst_18 {dimension_numbers = #tpu.dot_dimension_numbers<[2], [2], [1], [1], [0, 0, 0, 1, 1, 1], [0], [0]>} : vector<2x8x8xf32>, vector<2x8x8xf32>, vector<2x8x8xf32> -> vector<2x8x8xf32>
    "tpu.trace_stop"() : () -> ()
    %cst_19 = arith.constant dense<0xFF800000> : vector<2x8xf32>
    %33 = vector.multi_reduction <maximumf>, %32, %cst_19 [2] : vector<2x8x8xf32> to vector<2x8xf32>
    %34 = vector.shape_cast %33 : vector<2x8xf32> to vector<2x8x1xf32>
    %35 = vector.broadcast %34 : vector<2x8x1xf32> to vector<2x8x8xf32>
    %36 = arith.subf %32, %35 : vector<2x8x8xf32>
    %37 = math.exp %36 : vector<2x8x8xf32>
    %cst_20 = arith.constant dense<0.000000e+00> : vector<2x8xf32>
    %38 = vector.multi_reduction <add>, %37, %cst_20 [2] : vector<2x8x8xf32> to vector<2x8xf32>
    %39 = vector.shape_cast %38 : vector<2x8xf32> to vector<2x8x1xf32>
    %40 = tpu.reciprocal %39 {approx = true} : vector<2x8x1xf32> -> vector<2x8x1xf32>
    %41 = vector.broadcast %40 : vector<2x8x1xf32> to vector<2x8x8xf32>
    %42 = arith.mulf %37, %41 : vector<2x8x8xf32>
    "tpu.trace_start"() <{level = 10 : i32, message = "nqk,nkd->nqd"}> : () -> ()
    %cst_21 = arith.constant dense<0.000000e+00> : vector<2x8x8xf32>
    %43 = tpu.matmul %42, %31, %cst_21 {dimension_numbers = #tpu.dot_dimension_numbers<[2], [1], [1], [2], [0, 0, 0, 1, 1, 2], [0], [0]>} : vector<2x8x8xf32>, vector<2x8x8xf32>, vector<2x8x8xf32> -> vector<2x8x8xf32>
    "tpu.trace_stop"() : () -> ()
    %44 = vector.extract_strided_slice %11 {offsets = [0, 0, 16], sizes = [2, 8, 8], strides = [1, 1, 1]} : vector<2x8x32xf32> to vector<2x8x8xf32>
    %45 = vector.extract_strided_slice %12 {offsets = [0, 0, 16], sizes = [2, 8, 8], strides = [1, 1, 1]} : vector<2x8x32xf32> to vector<2x8x8xf32>
    %46 = vector.extract_strided_slice %13 {offsets = [0, 0, 16], sizes = [2, 8, 8], strides = [1, 1, 1]} : vector<2x8x32xf32> to vector<2x8x8xf32>
    "tpu.trace_start"() <{level = 10 : i32, message = "nqd,nkd->nqk"}> : () -> ()
    %cst_22 = arith.constant dense<0.000000e+00> : vector<2x8x8xf32>
    %47 = tpu.matmul %44, %45, %cst_22 {dimension_numbers = #tpu.dot_dimension_numbers<[2], [2], [1], [1], [0, 0, 0, 1, 1, 1], [0], [0]>} : vector<2x8x8xf32>, vector<2x8x8xf32>, vector<2x8x8xf32> -> vector<2x8x8xf32>
    "tpu.trace_stop"() : () -> ()
    %cst_23 = arith.constant dense<0xFF800000> : vector<2x8xf32>
    %48 = vector.multi_reduction <maximumf>, %47, %cst_23 [2] : vector<2x8x8xf32> to vector<2x8xf32>
    %49 = vector.shape_cast %48 : vector<2x8xf32> to vector<2x8x1xf32>
    %50 = vector.broadcast %49 : vector<2x8x1xf32> to vector<2x8x8xf32>
    %51 = arith.subf %47, %50 : vector<2x8x8xf32>
    %52 = math.exp %51 : vector<2x8x8xf32>
    %cst_24 = arith.constant dense<0.000000e+00> : vector<2x8xf32>
    %53 = vector.multi_reduction <add>, %52, %cst_24 [2] : vector<2x8x8xf32> to vector<2x8xf32>
    %54 = vector.shape_cast %53 : vector<2x8xf32> to vector<2x8x1xf32>
    %55 = tpu.reciprocal %54 {approx = true} : vector<2x8x1xf32> -> vector<2x8x1xf32>
    %56 = vector.broadcast %55 : vector<2x8x1xf32> to vector<2x8x8xf32>
    %57 = arith.mulf %52, %56 : vector<2x8x8xf32>
    "tpu.trace_start"() <{level = 10 : i32, message = "nqk,nkd->nqd"}> : () -> ()
    %cst_25 = arith.constant dense<0.000000e+00> : vector<2x8x8xf32>
    %58 = tpu.matmul %57, %46, %cst_25 {dimension_numbers = #tpu.dot_dimension_numbers<[2], [1], [1], [2], [0, 0, 0, 1, 1, 2], [0], [0]>} : vector<2x8x8xf32>, vector<2x8x8xf32>, vector<2x8x8xf32> -> vector<2x8x8xf32>
    "tpu.trace_stop"() : () -> ()
    %59 = vector.extract_strided_slice %11 {offsets = [0, 0, 24], sizes = [2, 8, 8], strides = [1, 1, 1]} : vector<2x8x32xf32> to vector<2x8x8xf32>
    %60 = vector.extract_strided_slice %12 {offsets = [0, 0, 24], sizes = [2, 8, 8], strides = [1, 1, 1]} : vector<2x8x32xf32> to vector<2x8x8xf32>
    %61 = vector.extract_strided_slice %13 {offsets = [0, 0, 24], sizes = [2, 8, 8], strides = [1, 1, 1]} : vector<2x8x32xf32> to vector<2x8x8xf32>
    "tpu.trace_start"() <{level = 10 : i32, message = "nqd,nkd->nqk"}> : () -> ()
    %cst_26 = arith.constant dense<0.000000e+00> : vector<2x8x8xf32>
    %62 = tpu.matmul %59, %60, %cst_26 {dimension_numbers = #tpu.dot_dimension_numbers<[2], [2], [1], [1], [0, 0, 0, 1, 1, 1], [0], [0]>} : vector<2x8x8xf32>, vector<2x8x8xf32>, vector<2x8x8xf32> -> vector<2x8x8xf32>
    "tpu.trace_stop"() : () -> ()
    %cst_27 = arith.constant dense<0xFF800000> : vector<2x8xf32>
    %63 = vector.multi_reduction <maximumf>, %62, %cst_27 [2] : vector<2x8x8xf32> to vector<2x8xf32>
    %64 = vector.shape_cast %63 : vector<2x8xf32> to vector<2x8x1xf32>
    %65 = vector.broadcast %64 : vector<2x8x1xf32> to vector<2x8x8xf32>
    %66 = arith.subf %62, %65 : vector<2x8x8xf32>
    %67 = math.exp %66 : vector<2x8x8xf32>
    %cst_28 = arith.constant dense<0.000000e+00> : vector<2x8xf32>
    %68 = vector.multi_reduction <add>, %67, %cst_28 [2] : vector<2x8x8xf32> to vector<2x8xf32>
    %69 = vector.shape_cast %68 : vector<2x8xf32> to vector<2x8x1xf32>
    %70 = tpu.reciprocal %69 {approx = true} : vector<2x8x1xf32> -> vector<2x8x1xf32>
    %71 = vector.broadcast %70 : vector<2x8x1xf32> to vector<2x8x8xf32>
    %72 = arith.mulf %67, %71 : vector<2x8x8xf32>
    "tpu.trace_start"() <{level = 10 : i32, message = "nqk,nkd->nqd"}> : () -> ()
    %cst_29 = arith.constant dense<0.000000e+00> : vector<2x8x8xf32>
    %73 = tpu.matmul %72, %61, %cst_29 {dimension_numbers = #tpu.dot_dimension_numbers<[2], [1], [1], [2], [0, 0, 0, 1, 1, 2], [0], [0]>} : vector<2x8x8xf32>, vector<2x8x8xf32>, vector<2x8x8xf32> -> vector<2x8x8xf32>
    "tpu.trace_stop"() : () -> ()
    %74 = tpu.concatenate %28, %43, %58, %73 in 2 : vector<2x8x8xf32>, vector<2x8x8xf32>, vector<2x8x8xf32>, vector<2x8x8xf32> -> vector<2x8x32xf32>
    %75 = vector.shape_cast %74 : vector<2x8x32xf32> to vector<16x32xf32>
    %c0_30 = arith.constant 0 : index
    %c0_31 = arith.constant 0 : index
    %76 = vector.load %arg7[%c0_30, %c0_31] : memref<32x32xf32, #tpu.memory_space<vmem>>, vector<32x32xf32>
    %cst_32 = arith.constant dense<0.000000e+00> : vector<16x32xf32>
    %77 = tpu.matmul %75, %76, %cst_32 {dimension_numbers = #tpu.dot_dimension_numbers<[1], [0], [0], [1], [0, 0, 1, 1], [], []>} : vector<16x32xf32>, vector<32x32xf32>, vector<16x32xf32> -> vector<16x32xf32>
    %c0_33 = arith.constant 0 : index
    %c0_34 = arith.constant 0 : index
    %78 = vector.load %arg8[%c0_33, %c0_34] : memref<16x32xf32, #tpu.memory_space<vmem>>, vector<16x32xf32>
    tpu.vector_store %arg8[%c0_33, %c0_34], %77 {strides = array<i32>} : memref<16x32xf32, #tpu.memory_space<vmem>>, vector<16x32xf32>,
    return
  }
  func.func @transform_0(%arg0: i32) -> (i32, i32) {
    %c0_i32 = arith.constant 0 : i32
    %c0_i32_0 = arith.constant 0 : i32
    %c0_i32_1 = arith.constant 0 : i32
    return %c0_i32, %c0_i32_0 : i32, i32
  }
  func.func @transform_1(%arg0: i32) -> (i32, i32) {
    %c0_i32 = arith.constant 0 : i32
    %c0_i32_0 = arith.constant 0 : i32
    %c0_i32_1 = arith.constant 0 : i32
    return %c0_i32, %c0_i32_0 : i32, i32
  }
  func.func @transform_2(%arg0: i32) -> (i32, i32) {
    %c0_i32 = arith.constant 0 : i32
    %c0_i32_0 = arith.constant 0 : i32
    %c0_i32_1 = arith.constant 0 : i32
    return %c0_i32, %c0_i32_0 : i32, i32
  }
  func.func @transform_3(%arg0: i32) -> (i32, i32) {
    %c0_i32 = arith.constant 0 : i32
    %c0_i32_0 = arith.constant 0 : i32
    %c0_i32_1 = arith.constant 0 : i32
    return %c0_i32, %c0_i32_0 : i32, i32
  }
  func.func @transform_4(%arg0: i32) -> (i32, i32) {
    %c0_i32 = arith.constant 0 : i32
    %c0_i32_0 = arith.constant 0 : i32
    %c0_i32_1 = arith.constant 0 : i32
    return %c0_i32, %c0_i32_0 : i32, i32
  }
  func.func @transform_5(%arg0: i32) -> (i32, i32) {
    %c0_i32 = arith.constant 0 : i32
    %c0_i32_0 = arith.constant 0 : i32
    %c0_i32_1 = arith.constant 0 : i32
    return %c0_i32, %c0_i32_0 : i32, i32
  }
  func.func @transform_6(%arg0: i32) -> (i32, i32) {
    %c0_i32 = arith.constant 0 : i32
    %c0_i32_0 = arith.constant 0 : i32
    %c0_i32_1 = arith.constant 0 : i32
    return %c0_i32, %c0_i32_0 : i32, i32
  }
  func.func @transform_7(%arg0: i32) -> (i32, i32) {
    %c0_i32 = arith.constant 0 : i32
    %c0_i32_0 = arith.constant 0 : i32
    %c0_i32_1 = arith.constant 0 : i32
    return %c0_i32, %c0_i32_0 : i32, i32
  }
}

</mosaic_0001>

<bundles_post_ra>
// kernel: tpu_custom_call.1
= control target key start
LH: loop header
LB: loop body
LE: loop exit
PB: predicated region body
PF: predicated region fallthrough
CT: control target
= control target key end

     0   :  { %12 = vsyncpa [#allocation3], 0  ;;  %s1322_s0 = inlined_call_operand.hbm [shape: f32[16,32], index: 0, kind: input, shape index: {}]   ;;  %s1323_s1 = inlined_call_operand.hbm [shape: f32[16,32], index: 1, kind: input, shape index: {}]   ;;  %s1324_s2 = inlined_call_operand.hbm [shape: f32[16,32], index: 2, kind: input, shape index: {}]   ;;  %s1325_s3 = inlined_call_operand.hbm [shape: f32[32,32], index: 3, kind: input, shape index: {}]   ;;  %s1326_s4 = inlined_call_operand.hbm [shape: f32[32,32], index: 4, kind: input, shape index: {}]   ;;  %s1327_s5 = inlined_call_operand.hbm [shape: f32[32,32], index: 5, kind: input, shape index: {}]   ;;  %s1328_s6 = inlined_call_operand.hbm [shape: f32[32,32], index: 6, kind: input, shape index: {}]   ;;  %s1329_s7 = inlined_call_operand.hbm [shape: f32[16,32], index: 7, kind: output, shape index: {}]  }
   0x1   :  { %13 = vsyncpa [#allocation6], 0 }
   0x2   :  { %14 = vsyncpa [#allocation9], 0 }
   0x3   :  { %15 = vsyncpa [#allocation12], 0 }
   0x4   :  { %16 = vsyncpa [#allocation4], 0  ;;  %s34_s26 = sshll.u32 %s1323_s1, 4  ;;  %s1136_s27 = smov [#allocation5]   ;;  %s35_s26 = int_to_ptr.hbm [resolvable:$true] %s34_s26 }
   0x5   :  { %s36_s28 = sshll.u32 %s1136_s27, 4  ;;  %s60_s8 = sshll.u32 %s1325_s3, 4  ;;  %s37_s28 = int_to_ptr.vmem [resolvable:$true] %s36_s28  ;;  %s61_s8 = int_to_ptr.hbm [resolvable:$true] %s60_s8 }
   0x6   :  { %s1137_s9 = smov 128   ;;  %s1138_s10 = smov 8  }
   0x7   :  { %42 = dma.hbm_to_vmem [thread:$0]  %s35_s26, 256, %s37_s28, [#allocation6], %s1137_s9, %s1137_s9, %s1138_s10  }
   0x8   :  { %s1139_s11 = smov [#allocation8]   ;;  %s86_s1 = sshll.u32 %s1327_s5, 4  ;;  %s87_s1 = int_to_ptr.hbm [resolvable:$true] %s86_s1 }
   0x9   :  { %s62_s12 = sshll.u32 %s1139_s11, 4  ;;  %s21_s16 = sshll.u32 %s1322_s0, 4  ;;  %s63_s12 = int_to_ptr.vmem [resolvable:$true] %s62_s12  ;;  %s22_s16 = int_to_ptr.hbm [resolvable:$true] %s21_s16 }
   0xa   :  { %68 = dma.hbm_to_vmem [thread:$0]  %s61_s8, 512, %s63_s12, [#allocation9], %s1137_s9, %s1137_s9, %s1138_s10  }
   0xb   :  { %s1140_s17 = smov [#allocation11]   ;;  %s1141_s19 = smov [#allocation2]  }
   0xc   :  { %s88_s18 = sshll.u32 %s1140_s17, 4  ;;  %s23_s5 = sshll.u32 %s1141_s19, 4  ;;  %s89_s18 = int_to_ptr.vmem [resolvable:$true] %s88_s18  ;;  %s24_s5 = int_to_ptr.vmem [resolvable:$true] %s23_s5 }
   0xd   :  { %94 = dma.hbm_to_vmem [thread:$0]  %s87_s1, 512, %s89_s18, [#allocation12], %s1137_s9, %s1137_s9, %s1138_s10  }
   0xe   :  { %s47_s22 = sshll.u32 %s1324_s2, 4  ;;  %s73_s24 = sshll.u32 %s1326_s4, 4  ;;  %s48_s22 = int_to_ptr.hbm [resolvable:$true] %s47_s22  ;;  %s74_s24 = int_to_ptr.hbm [resolvable:$true] %s73_s24 }
   0xf   :  { %29 = dma.hbm_to_vmem [thread:$0]  %s22_s16, 256, %s24_s5, [#allocation3], %s1137_s9, %s1137_s9, %s1138_s10  }
  0x10   :  { %s1142_s25 = smov [#allocation7]   ;;  %s1143_s27 = smov [#allocation10]  }
  0x11   :  { %s49_s26 = sshll.u32 %s1142_s25, 4  ;;  %s75_s2 = sshll.u32 %s1143_s27, 4  ;;  %s50_s26 = int_to_ptr.vmem [resolvable:$true] %s49_s26  ;;  %s76_s2 = int_to_ptr.vmem [resolvable:$true] %s75_s2 }
  0x12   :  { %55 = dma.hbm_to_vmem [thread:$0]  %s48_s22, 256, %s50_s26, [#allocation6], %s1137_s9, %s1137_s9, %s1138_s10  }
  0x13   :  { %s99_s30 = sshll.u32 %s1328_s6, 4  ;;  %s1144_s4 = smov [#allocation13]   ;;  %s100_s30 = int_to_ptr.hbm [resolvable:$true] %s99_s30 }
  0x14   :  { %81 = dma.hbm_to_vmem [thread:$0]  %s74_s24, 512, %s76_s2, [#allocation9], %s1137_s9, %s1137_s9, %s1138_s10  }
  0x15   :  { %s101_s8 = sshll.u32 %s1144_s4, 4  ;;  %s102_s8 = int_to_ptr.vmem [resolvable:$true] %s101_s8 }
  0x16   :  { %107 = dma.hbm_to_vmem [thread:$0]  %s100_s30, 512, %s102_s8, [#allocation12], %s1137_s9, %s1137_s9, %s1138_s10  }
  0x17   :  { %1126 = dma.done.wait [#allocation3], 256  }
  0x18   :  { %1127 = vsyncadd [#allocation3], 4294967040 }
  0x19   :  { %1128 = dma.done.wait [#allocation6], 512  }
  0x1a   :  { %1129 = vsyncadd [#allocation6], 4294966784 }
  0x1b   :  { %1130 = dma.done.wait [#allocation9], 1024  }
  0x1c   :  { %1131 = vsyncadd [#allocation9], 4294966272 }
  0x1d   :  { %1132 = dma.done.wait [#allocation12], 1024  }
  0x1e   :  { %1133 = vsyncadd [#allocation12], 4294966272  ;;  %v177_v0 = vld [vmem:[#allocation10 + $0x18] sm:$0xff]  ;;  %v176_v2 = vld [vmem:[#allocation10 + $0x10] sm:$0xff]  ;;  %vm142_vm0 = vcmask 261120   ;;  %vm244_vm1 = vcmask 64512  }
  0x1f   :  { %v141_v1 = vld [vmem:[#allocation8 + $0x18] sm:$0xff]  ;;  %196 = vmatpush.msra.mxu1 %v177_v0  ;;  %v140_v3 = vld [vmem:[#allocation8 + $0x10] sm:$0xff]  ;;  %878 = vmatpush.msra.mxu2 %v177_v0  ;;  %v175_v4 = vld [vmem:[#allocation10 + $0x8] sm:$0xff]  ;;  %s1145_s6 = smov 112   ;;  %s1146_s11 = smov 120   ;;  %vm783_vm2 = vcmask 130048  }
  0x20   :  { %161 = vmatpush.msra.mxu0 %v141_v1  ;;  %v139_v5 = vld [vmem:[#allocation8 + $0x8] sm:$0xff]  ;;  %v174_v6 = vld [vmem:[#allocation10] sm:$0xff]  ;;  %v136_v9 = vld [vmem:[#allocation2] sm:$0xff]  ;;  %s1147_s12 = smov 104   ;;  %s1148_s13 = smov 16   ;;  %vm786_vm3 = vcmask 195584  }
  0x21   :  { %197 = vmatpush.msra.mxu1 %v176_v2  ;;  %879 = vmatpush.msra.mxu2 %v176_v2  ;;  %v138_v7 = vld [vmem:[#allocation8] sm:$0xff]  ;;  %v173_v10 = vld [vmem:[#allocation5 + $0x8] sm:$0xff]  ;;  %v137_v11 = vld [vmem:[#allocation2 + $0x8] sm:$0xff]  ;;  %s1149_s14 = smov 24   ;;  %s1150_s1 = smov [#allocation14]  }
  0x22   :  { %162 = vmatpush.msra.mxu0 %v140_v3  ;;  %v172_v8 = vld [vmem:[#allocation5] sm:$0xff]  ;;  %v212_v18 = vld [vmem:[#allocation11 + $0x18] sm:$0xff]  ;;  %v211_v19 = vld [vmem:[#allocation11 + $0x10] sm:$0xff]  ;;  %s828_s3 = sshll.u32 %s1150_s1, 4  ;;  %s830_s17 = sshll.u32 %s1329_s7, 4  ;;  %s829_s3 = int_to_ptr.vmem [resolvable:$true] %s828_s3  ;;  %s831_s17 = int_to_ptr.hbm [resolvable:$true] %s830_s17 }
  0x23   :  { %198 = vmatpush.msra.mxu1 %v175_v4  ;;  %880 = vmatpush.msra.mxu2 %v175_v4  ;;  %v210_v20 = vld [vmem:[#allocation11 + $0x8] sm:$0xff]  ;;  %v209_v21 = vld [vmem:[#allocation11] sm:$0xff]  ;;  %v207_v22 = vld [vmem:[#allocation7] sm:$0xff] }
  0x24   :  { %163 = vmatpush.msra.mxu0 %v139_v5  ;;  %v208_v23 = vld [vmem:[#allocation7 + $0x8] sm:$0xff] }
  0x25   :  { %199 = vmatpush.msra.mxu1 %v174_v6  ;;  %881 = vmatpush.msra.mxu2 %v174_v6 }
  0x26   :  { %164 = vmatpush.msra.mxu0 %v138_v7  ;;  %848 = vmatmul.msk.f32.vlgmr.msra.gmra.mxu1 %vm142_vm0, %v172_v8 }
  0x27   :  { %846 = vmatmul.msk.f32.vlgmr.msra.gmra.mxu0 %vm142_vm0, %v136_v9  ;;  %849 = vmatmul.msk.f32.vlgmr.msra.gmra.mxu2 %vm142_vm0, %v173_v10 }
  0x28   :  { %231 = vmatpush.msrb.mxu2 %v212_v18 }
  0x2a   :  { %232 = vmatpush.msrb.mxu2 %v211_v19 }
  0x2c   :  { %233 = vmatpush.msrb.mxu2 %v210_v20 }
  0x2e   :  { %234 = vmatpush.msrb.mxu2 %v209_v21 }
  0x2f   :  { %847 = vmatmul.msk.f32.gmra.mxu0 %vm142_vm0, %v137_v11  ;;  %850 = vmatmul.msk.f32.vlgmr.msrb.gmra.mxu2 %vm142_vm0, %v207_v22 }
  0x37   :  { %851 = vmatmul.msk.f32.gmra.mxu2 %vm142_vm0, %v208_v23 }
  0xa3   :  { %v201_v12 = vpop.f32.mrf.mxu1 }
  0xa4   :  { %v166_v13 = vpop.f32.mrf.mxu0  ;;  %499 = vrot.lane.b32.xlu1 %v201_v12, %s1145_s6  ;;  %367 = vrot.lane.b32.xlu0 %v201_v12, %s1146_s11 }
  0xa5   :  { %v242_v14 = vmul.f32 0.17677669, %v166_v13  ;;  %852 = vmatpush.xpose.msk.msra.mxu3 %vm244_vm1, %v201_v12 }
  0xa7   :  { %497 = vrot.lane.b32.xlu2 %v242_v14, %s1145_s6 }
  0xa8   :  { %853 = vmatmul.msk.f32.vlgmr.msra.gmra.mxu3 %vm244_vm1, %v242_v14 }
  0xaa   :  { %v204_v15 = vpop.f32.mrf.mxu2 }
  0xab   :  { %854 = vmatpush.xpose.msk.msrb.mxu3 %vm244_vm1, %v204_v15 }
  0xac   :  { %v169_v16 = vpop.f32.mrf.mxu0  ;;  %395 = vrot.lane.b32.xlu1 %v204_v15, %s1146_s11  ;;  %365 = vrot.lane.b32.xlu0 %v242_v14, %s1146_s11 }
  0xad   :  { %v243_v17 = vmul.f32 0.17677669, %v169_v16 }
  0xaf   :  { %393 = vrot.lane.b32.xlu2 %v243_v17, %s1146_s11 }
  0xb0   :  { %855 = vmatmul.msk.f32.vlgmr.msrb.gmra.mxu3 %vm244_vm1, %v243_v17 }
  0xb2   :  { %v1269_v40 = vpop.f32.mrf.mxu2 }
  0xb3   :  { %337 = vmatpush.msra.mxu3 %v1269_v40 }
  0xb4   :  { %629 = vrot.lane.b32.xlu1 %v201_v12, %s1147_s12  ;;  %527 = vrot.lane.b32.xlu0 %v204_v15, %s1145_s6 }
  0xb7   :  { %525 = vrot.lane.b32.xlu2 %v243_v17, %s1145_s6 }
  0xba   :  { %v1272_v41 = vpop.f32.mrf.mxu2 }
  0xbb   :  { %360 = vmatpush.msrb.mxu0 %v1272_v41 }
  0xbc   :  { %657 = vrot.lane.b32.xlu1 %v204_v15, %s1147_s12  ;;  %627 = vrot.lane.b32.xlu0 %v242_v14, %s1147_s12 }
  0xbf   :  { %655 = vrot.lane.b32.xlu2 %v243_v17, %s1147_s12 }
 0x101   :  { %v498_v24 = vpop.permute.xlu2 %497 }
 0x109   :  { %v394_v27 = vpop.permute.xlu2 %393 }
 0x111   :  { %v526_v32 = vpop.permute.xlu2 %525 }
 0x116   :  { %v500_v25 = vpop.permute.xlu1 %499  ;;  %v368_v26 = vpop.permute.xlu0 %367 }
 0x117   :  { %858 = vmatpush.xpose.msk.msrb.mxu1 %vm244_vm1, %v368_v26 }
 0x119   :  { %v656_v37 = vpop.permute.xlu2 %655 }
 0x11b   :  { %864 = vmatpush.xpose.msk.msra.mxu1 %vm244_vm1, %v500_v25 }
 0x11e   :  { %v396_v28 = vpop.permute.xlu1 %395  ;;  %v366_v29 = vpop.permute.xlu0 %365 }
 0x11f   :  { %860 = vmatpush.xpose.msk.msra.mxu2 %vm244_vm1, %v396_v28  ;;  %859 = vmatmul.msk.f32.vlgmr.msrb.gmra.mxu1 %vm244_vm1, %v366_v29 }
 0x122   :  { %861 = vmatmul.msk.f32.vlgmr.msra.gmra.mxu2 %vm244_vm1, %v394_v27 }
 0x126   :  { %v630_v30 = vpop.permute.xlu1 %629  ;;  %v528_v31 = vpop.permute.xlu0 %527 }
 0x127   :  { %870 = vmatpush.xpose.msk.msrb.mxu1 %vm244_vm1, %v630_v30  ;;  %866 = vmatpush.xpose.msk.msrb.mxu2 %vm244_vm1, %v528_v31  ;;  %v897_v30 = vpack.i.bf16 %v1272_v41, %v1269_v40 }
 0x128   :  { %865 = vmatmul.msk.f32.vlgmr.msra.gmra.mxu1 %vm244_vm1, %v498_v24 }
 0x12a   :  { %867 = vmatmul.msk.f32.vlgmr.msrb.gmra.mxu2 %vm244_vm1, %v526_v32 }
 0x12b   :  { %v268_v33 = vpop.f32.mrf.mxu3 }
 0x12c   :  { %v297_v34 = vsel %vm244_vm1, %v268_v33, -inf }
 0x12d   :  { %298 = vmax.xlane.f32.xlu0 %v297_v34 }
 0x12e   :  { %v658_v35 = vpop.permute.xlu1 %657  ;;  %v628_v36 = vpop.permute.xlu0 %627 }
 0x12f   :  { %872 = vmatpush.xpose.msk.msra.mxu2 %vm244_vm1, %v658_v35 }
 0x130   :  { %871 = vmatmul.msk.f32.vlgmr.msrb.gmra.mxu1 %vm244_vm1, %v628_v36 }
 0x132   :  { %873 = vmatmul.msk.f32.vlgmr.msra.gmra.mxu2 %vm244_vm1, %v656_v37 }
 0x133   :  { %v294_v38 = vpop.f32.mrf.mxu3 }
 0x134   :  { %v300_v39 = vsel %vm244_vm1, %v294_v38, -inf }
 0x135   :  { %301 = vmax.xlane.f32.xlu2 %v300_v39 }
 0x19c   :  { %v390_v42 = vpop.f32.mrf.mxu1 }
 0x19d   :  { %v421_v43 = vsel %vm244_vm1, %v390_v42, -inf }
 0x19e   :  { %422 = vmax.xlane.f32.xlu1 %v421_v43 }
 0x1a0   :  { %v299_v44 = vpop.xlane.xlu0 %298 }
 0x1a1   :  { %v303_v45 = vsub.f32 %v268_v33, %v299_v44 }
 0x1a3   :  { %v305_v50 = vmul.f32 1.442695, %v303_v45 }
 0x1a5   :  { %v522_v46 = vpop.f32.mrf.mxu1  ;;  %v418_v47 = vpop.f32.mrf.mxu2  ;;  %902 = vpow2.f32 %v305_v50 }
 0x1a6   :  { %v553_v48 = vsel %vm244_vm1, %v522_v46, -inf  ;;  %v424_v49 = vsel %vm244_vm1, %v418_v47, -inf }
 0x1a7   :  { %554 = vmax.xlane.f32.xlu2 %v553_v48  ;;  %425 = vmax.xlane.f32.xlu0 %v424_v49 }
 0x1a8   :  { %v302_v51 = vpop.xlane.xlu2 %301 }
 0x1a9   :  { %v304_v52 = vsub.f32 %v294_v38, %v302_v51 }
 0x1ab   :  { %v307_v53 = vmul.f32 1.442695, %v304_v52  ;;  %v903_v58 = vpop.eup %902 }
 0x1ac   :  { %v309_v61 = vsel %vm244_vm1, %v903_v58, 0.0 }
 0x1ad   :  { %904 = vpow2.f32 %v307_v53  ;;  %v652_v54 = vpop.f32.mrf.mxu1  ;;  %v550_v55 = vpop.f32.mrf.mxu2 }
 0x1ae   :  { %v683_v56 = vsel %vm244_vm1, %v652_v54, -inf  ;;  %v556_v57 = vsel %vm244_vm1, %v550_v55, -inf }
 0x1af   :  { %684 = vmax.xlane.f32.xlu1 %v683_v56  ;;  %557 = vmax.xlane.f32.xlu2 %v556_v57 }
 0x1b3   :  { %v905_v59 = vpop.eup %904 }
 0x1b4   :  { %v312_v60 = vsel %vm244_vm1, %v905_v59, 0.0 }
 0x1b5   :  { %313 = vadd.xlane.f32.xlu0 %v312_v60  ;;  %v680_v62 = vpop.f32.mrf.mxu2 }
 0x1b6   :  { %v686_v63 = vsel %vm244_vm1, %v680_v62, -inf }
 0x1b7   :  { %310 = vadd.xlane.f32.xlu1 %v309_v61 }
 0x1bd   :  { %687 = vmax.xlane.f32.xlu0 %v686_v63 }
 0x1d1   :  { %575 = vrot.lane.b32.xlu0 %v1269_v40, %s1145_s6 }
 0x211   :  { %v423_v0 = vpop.xlane.xlu1 %422 }
 0x212   :  { %v427_v1 = vsub.f32 %v390_v42, %v423_v0 }
 0x214   :  { %v429_v2 = vmul.f32 1.442695, %v427_v1 }
 0x216   :  { %906 = vpow2.f32 %v429_v2 }
 0x21a   :  { %v555_v3 = vpop.xlane.xlu2 %554  ;;  %v426_v4 = vpop.xlane.xlu0 %425 }
 0x21b   :  { %v559_v5 = vsub.f32 %v522_v46, %v555_v3  ;;  %v428_v6 = vsub.f32 %v418_v47, %v426_v4 }
 0x21c   :  { %v907_v7 = vpop.eup %906 }
 0x21d   :  { %v561_v8 = vmul.f32 1.442695, %v559_v5  ;;  %v431_v9 = vmul.f32 1.442695, %v428_v6  ;;  %v433_v10 = vsel %vm244_vm1, %v907_v7, 0.0  ;;  %v792_v6 = vld [vmem:[#allocation13 + $0x18] sm:$0xff] }
 0x21e   :  { %434 = vadd.xlane.f32.xlu2 %v433_v10  ;;  %811 = vmatpush.msra.mxu1 %v792_v6 }
 0x21f   :  { %908 = vpow2.f32 %v561_v8  ;;  %v790_v8 = vld [vmem:[#allocation13 + $0x8] sm:$0xff] }
 0x220   :  { %910 = vpow2.f32 %v431_v9  ;;  %v789_v9 = vld [vmem:[#allocation13] sm:$0xff] }
 0x222   :  { %v685_v11 = vpop.xlane.xlu1 %684  ;;  %v558_v13 = vpop.xlane.xlu2 %557 }
 0x223   :  { %v689_v12 = vsub.f32 %v652_v54, %v685_v11  ;;  %v560_v16 = vsub.f32 %v550_v55, %v558_v13 }
 0x225   :  { %v909_v14 = vpop.eup %908  ;;  %v691_v15 = vmul.f32 1.442695, %v689_v12  ;;  %v563_v21 = vmul.f32 1.442695, %v560_v16 }
 0x226   :  { %v911_v17 = vpop.eup %910  ;;  %v565_v18 = vsel %vm244_vm1, %v909_v14, 0.0 }
 0x227   :  { %912 = vpow2.f32 %v691_v15  ;;  %566 = vadd.xlane.f32.xlu1 %v565_v18  ;;  %v436_v19 = vsel %vm244_vm1, %v911_v17, 0.0 }
 0x228   :  { %437 = vadd.xlane.f32.xlu0 %v436_v19  ;;  %v314_v20 = vpop.xlane.xlu0 %313 }
 0x229   :  { %914 = vrcp.f32 %v314_v20 }
 0x22a   :  { %v311_v22 = vpop.xlane.xlu1 %310 }
 0x22b   :  { %916 = vrcp.f32 %v311_v22 }
 0x22c   :  { %918 = vpow2.f32 %v563_v21 }
 0x22d   :  { %v913_v23 = vpop.eup %912 }
 0x22e   :  { %v695_v24 = vsel %vm244_vm1, %v913_v23, 0.0 }
 0x22f   :  { %v915_v25 = vpop.eup %914  ;;  %696 = vadd.xlane.f32.xlu1 %v695_v24 }
 0x230   :  { %v318_v26 = vmul.f32 %v915_v25, %v905_v59  ;;  %v688_v32 = vpop.xlane.xlu0 %687 }
 0x231   :  { %v917_v27 = vpop.eup %916  ;;  %v690_v33 = vsub.f32 %v680_v62, %v688_v32 }
 0x232   :  { %v317_v28 = vmul.f32 %v917_v27, %v903_v58  ;;  %857 = vmatmul.msk.f32.vlgmr.msrb.gmra.mxu0 %vm244_vm1, %v318_v26  ;;  %v919_v29 = vpop.eup %918 }
 0x233   :  { %v568_v31 = vsel %vm244_vm1, %v919_v29, 0.0  ;;  %v693_v34 = vmul.f32 1.442695, %v690_v33 }
 0x234   :  { %856 = vmatmul.msk.f32.vlgmr.msra.gmra.mxu3 %vm244_vm1, %v317_v28 }
 0x235   :  { %920 = vpow2.f32 %v693_v34 }
 0x236   :  { %898 = vrot.lane.b32.xlu2 %v897_v30, %s1146_s11 }
 0x237   :  { %569 = vadd.xlane.f32.xlu1 %v568_v31 }
 0x23b   :  { %v921_v35 = vpop.eup %920 }
 0x23c   :  { %601 = vrot.lane.b32.xlu0 %v1272_v41, %s1145_s6  ;;  %v698_v36 = vsel %vm244_vm1, %v921_v35, 0.0 }
 0x243   :  { %v576_v38 = vpop.permute.xlu0 %575 }
 0x244   :  { %731 = vrot.lane.b32.xlu0 %v1272_v41, %s1147_s12 }
 0x250   :  { %705 = vrot.lane.b32.xlu1 %v1269_v40, %s1147_s12 }
 0x25f   :  { %699 = vadd.xlane.f32.xlu2 %v698_v36 }
 0x291   :  { %v435_v37 = vpop.xlane.xlu2 %434 }
 0x292   :  { %922 = vrcp.f32 %v435_v37 }
 0x298   :  { %v923_v39 = vpop.eup %922 }
 0x299   :  { %v899_v43 = vpop.permute.xlu2 %898  ;;  %v441_v46 = vmul.f32 %v923_v39, %v907_v7  ;;  %v791_v7 = vld [vmem:[#allocation13 + $0x10] sm:$0xff] }
 0x29a   :  { %v567_v42 = vpop.xlane.xlu1 %566  ;;  %v901_v44 = vunpack.i.h.bf16 %v899_v43  ;;  %v900_v41 = vunpack.i.l.bf16 %v899_v43  ;;  %812 = vmatpush.msra.mxu1 %v791_v7 }
 0x29b   :  { %924 = vrcp.f32 %v567_v42  ;;  %v438_v45 = vpop.xlane.xlu0 %437 }
 0x29c   :  { %926 = vrcp.f32 %v438_v45  ;;  %465 = vmatpush.msrb.mxu3 %v900_v41  ;;  %492 = vmatpush.msra.mxu0 %v901_v44 }
 0x29d   :  { %862 = vmatmul.msk.f32.vlgmr.msrb.gmra.mxu3 %vm244_vm1, %v441_v46  ;;  %813 = vmatpush.msra.mxu1 %v790_v8 }
 0x29e   :  { %596 = vmatpush.msra.mxu3 %v576_v38 }
 0x29f   :  { %814 = vmatpush.msra.mxu1 %v789_v9 }
 0x2a1   :  { %v925_v40 = vpop.eup %924 }
 0x2a2   :  { %v927_v47 = vpop.eup %926  ;;  %v697_v48 = vpop.xlane.xlu1 %696  ;;  %v573_v50 = vmul.f32 %v925_v40, %v909_v14 }
 0x2a3   :  { %v442_v49 = vmul.f32 %v927_v47, %v911_v17 }
 0x2a5   :  { %863 = vmatmul.msk.f32.vlgmr.msra.gmra.mxu0 %vm244_vm1, %v442_v49  ;;  %868 = vmatmul.msk.f32.vlgmr.msra.gmra.mxu3 %vm244_vm1, %v573_v50 }
 0x2aa   :  { %v570_v51 = vpop.xlane.xlu1 %569 }
 0x2ab   :  { %928 = vrcp.f32 %v570_v51 }
 0x2ac   :  { %930 = vrcp.f32 %v697_v48 }
 0x2ae   :  { %v602_v52 = vpop.permute.xlu0 %601 }
 0x2af   :  { %622 = vmatpush.msrb.mxu0 %v602_v52  ;;  %v362_v0 = vpop.f32.mrf.mxu0 }
 0x2b1   :  { %v929_v53 = vpop.eup %928 }
 0x2b2   :  { %v574_v54 = vmul.f32 %v929_v53, %v919_v29  ;;  %v931_v56 = vpop.eup %930 }
 0x2b3   :  { %v703_v57 = vmul.f32 %v931_v56, %v913_v23 }
 0x2b4   :  { %869 = vmatmul.msk.f32.vlgmr.msrb.gmra.mxu0 %vm244_vm1, %v574_v54 }
 0x2b6   :  { %v732_v55 = vpop.permute.xlu0 %731 }
 0x2b7   :  { %752 = vmatpush.msra.mxu0 %v732_v55  ;;  %v339_v62 = vpop.f32.mrf.mxu3 }
 0x2c2   :  { %v706_v58 = vpop.permute.xlu1 %705 }
 0x2c3   :  { %726 = vmatpush.msrb.mxu3 %v706_v58 }
 0x2c4   :  { %874 = vmatmul.msk.f32.vlgmr.msrb.gmra.mxu3 %vm244_vm1, %v703_v57 }
 0x2d2   :  { %v700_v59 = vpop.xlane.xlu2 %699 }
 0x2d3   :  { %932 = vrcp.f32 %v700_v59 }
 0x2d9   :  { %v933_v60 = vpop.eup %932 }
 0x2da   :  { %v704_v61 = vmul.f32 %v933_v60, %v921_v35 }
 0x2dc   :  { %875 = vmatmul.msk.f32.vlgmr.msra.gmra.mxu0 %vm244_vm1, %v704_v61 }
 0x320   :  { %v467_v63 = vpop.f32.mrf.mxu3 }
 0x321   :  { %759 = vrot.lane.b32.xlu1 %v467_v63, %s1138_s10 }
 0x322   :  { %v494_v2 = vpop.f32.mrf.mxu0 }
 0x328   :  { %v598_v1 = vpop.f32.mrf.mxu3 }
 0x329   :  { %767 = vrot.lane.b32.xlu0 %v598_v1, %s1148_s13 }
 0x331   :  { %761 = vrot.lane.b32.xlu0 %v494_v2, %s1138_s10  ;;  %v624_v4 = vpop.f32.mrf.mxu0 }
 0x347   :  { %v728_v3 = vpop.f32.mrf.mxu3 }
 0x348   :  { %775 = vrot.lane.b32.xlu1 %v728_v3, %s1149_s14 }
 0x350   :  { %769 = vrot.lane.b32.xlu1 %v624_v4, %s1148_s13 }
 0x359   :  { %v754_v5 = vpop.f32.mrf.mxu0 }
 0x35a   :  { %777 = vrot.lane.b32.xlu0 %v754_v5, %s1149_s14 }
 0x393   :  { %v760_v10 = vpop.permute.xlu1 %759 }
 0x394   :  { %v781_v12 = vsel %vm244_vm1, %v339_v62, %v760_v10 }
 0x39b   :  { %v768_v11 = vpop.permute.xlu0 %767 }
 0x39c   :  { %v784_v13 = vsel %vm783_vm2, %v781_v12, %v768_v11 }
 0x3a3   :  { %v762_v16 = vpop.permute.xlu0 %761 }
 0x3a4   :  { %v782_v18 = vsel %vm244_vm1, %v362_v0, %v762_v16 }
 0x3ba   :  { %v776_v14 = vpop.permute.xlu1 %775 }
 0x3bb   :  { %v787_v15 = vsel %vm786_vm3, %v784_v13, %v776_v14 }
 0x3bc   :  { %876 = vmatmul.msk.f32.vlgmr.msra.gmra.mxu1 %vm142_vm0, %v787_v15 }
 0x3c2   :  { %v770_v17 = vpop.permute.xlu1 %769 }
 0x3c3   :  { %v785_v19 = vsel %vm783_vm2, %v782_v18, %v770_v17 }
 0x3cc   :  { %v778_v20 = vpop.permute.xlu0 %777 }
 0x3cd   :  { %v788_v21 = vsel %vm786_vm3, %v785_v19, %v778_v20 }
 0x3ce   :  { %877 = vmatmul.msk.f32.gmra.mxu1 %vm142_vm0, %v788_v21 }
 0x439   :  { %v816_v22 = vpop.f32.mrf.mxu1 }
 0x43a   :  { %822 = vst.msk [vmem:[#allocation14] sm:$0xff] %vm142_vm0, %v816_v22 }
 0x44b   :  { %v819_v23 = vpop.f32.mrf.mxu1 }
 0x44c   :  { %823 = vst.msk [vmem:[#allocation14 + $0x8] sm:$0xff] %vm142_vm0, %v819_v23 }
 0x44d   :  { %836 = dma.vmem_to_hbm [thread:$0]  %s829_s3, 256, %s831_s17, [#allocation4], %s1137_s9, %s1137_s9, %s1138_s10  }
 0x44e   :  { %1134 = dma.done.wait [#allocation4], 256  }
 0x44f   :  { %1135 = vsyncadd [#allocation4], 4294967040 }
 0x450   :  { %841 = vsyncpa [#allocation3], 1 }
 0x451   :  { %842 = vsyncpa [#allocation6], 1 }
 0x452   :  { %843 = vsyncpa [#allocation9], 1 }
 0x453   :  { %844 = vsyncpa [#allocation12], 1 }
 0x454   :  { %845 = vsyncpa [#allocation4], 1 }

</bundles_post_ra>
